<compile_context>
chip_gen: v6e
topology: v6e:2x2x1
jax: 0.10.0
libtpu: 0.0.40
codegen_flags: <defaults>
</compile_context>

<pallas_src>
import functools

import jax
import jax.numpy as jnp
from jax.experimental import pallas as pl
from jax.experimental.pallas import tpu as pltpu


def _round_up(x: int, m: int) -> int:
    return (x + m - 1) // m * m


def _make_hier_vq_kernel(num_layers: int, t_valid: int):
    """Fused HierVQ kernel.

    Ref layout (inputs..., outputs...):
      x_ref                       : [C, TT]   token tile (T on lanes, batch squeezed)
      per layer: e_dist [K, C+1]  rows = codes,   cols = [-2*e_k | ||e_k||^2]
                 e_gat  [C+1, K]  rows = channels + all-ones row (lane-dense, K on lanes)
      q_ref                       : [C, TT]   quantized output of the last layer
      sse_ref                     : [1, 128]  per-(b, t-tile) partial SSE, lane l = layer l
    """

    def kernel(x_ref, *refs):
        e_dist_refs = refs[0:2 * num_layers:2]
        e_gat_refs = refs[1:2 * num_layers:2]
        q_ref = refs[2 * num_layers]
        sse_ref = refs[2 * num_layers + 1]

        c, tt = q_ref.shape
        ti = pl.program_id(1)

        x = x_ref[...].astype(jnp.float32)                                # [C, TT]
        # Augmented activations: fixed all-ones last row folds the ||e||^2 bias
        # (and the -2 scale) into the distance matmul -> no K x TT VPU pass.
        cur = jnp.concatenate([x, jnp.ones((1, tt), jnp.float32)], axis=0)  # [C+1, TT]

        # Mask tokens past the true T (tile padding) out of the SSE.
        tok = ti * tt + jax.lax.broadcasted_iota(jnp.int32, (1, tt), 1)
        valid = (tok < t_valid).astype(jnp.float32)                        # [1, TT]

        lane = jax.lax.broadcasted_iota(jnp.int32, (1, 128), 1)
        sse_vec = jnp.zeros((1, 128), jnp.float32)

        for l in range(num_layers):
            e_d = e_dist_refs[l][...]                                      # [K, C+1]
            e_g = e_gat_refs[l][...]                                       # [C+1, K]
            k = e_d.shape[0]

            # dist (up to the per-token constant ||x||^2, irrelevant to argmin):
            #   dist[k, n] = ||e_k||^2 - 2 e_k . x_n   -- a single MXU matmul.
            dist = jnp.dot(e_d, cur, preferred_element_type=jnp.float32)   # [K, TT]

            # First-argmin over codes (torch.argmin tie-break). The [K, 1]
            # column iota broadcasts over lanes, so no K x TT iota is built.
            # (jnp.argmin is avoided on purpose: the iota+min form is
            #  guaranteed to lower on all Mosaic versions.)
            min_val = jnp.min(dist, axis=0, keepdims=True)                 # [1, TT]
            code = jax.lax.broadcasted_iota(jnp.int32, (k, 1), 0)          # [K, 1]
            idx = jnp.min(jnp.where(dist == min_val, code, k),
                          axis=0, keepdims=True)                           # [1, TT]
            onehot = (code == idx).astype(jnp.float32)                     # [K, TT]

            # One-hot gather via the MXU. e_gat's last row is all ones, so the
            # augmented 1-row is regenerated exactly -> no concat per layer,
            # and quant equals codebook rows bit-exactly in f32.
            new = jnp.dot(e_g, onehot, preferred_element_type=jnp.float32)  # [C+1, TT]

            # Direct SSE of (quant - x): exact (no expanded-square cancellation);
            # the augmented row contributes exactly 0.
            diff = (new - cur) * valid
            sse_l = jnp.sum(diff * diff)
            sse_vec = sse_vec + jnp.where(lane == l, sse_l, 0.0)

            cur = new

        q_ref[...] = cur[:c, :].astype(q_ref.dtype)
        sse_ref[...] = sse_vec

    return kernel


def _est_vmem_bytes(c: int, tile_t: int, code_sizes, x_itemsize: int) -> int:
    """Rough per-call VMEM footprint (tiles + resident codebooks + temporaries)."""
    io = 2 * 2 * c * tile_t * x_itemsize            # double-buffered x / q tiles
    cb = 0
    for k in code_sizes:                            # single-buffered codebooks
        cb += _round_up(k, 8) * _round_up(c + 1, 128) * 4      # e_dist [K, C+1]
        cb += _round_up(c + 1, 8) * _round_up(k, 128) * 4      # e_gat  [C+1, K]
    kmax = max(code_sizes)
    tmp = 5 * kmax * tile_t * 4                     # dist / tie-break select / onehot (+masks)
    tmp += 4 * (c + 1) * tile_t * 4                 # cur / new / diff
    return io + cb + tmp + (1 << 16)


def _default_tile_t_max() -> int:
    try:
        kind = jax.devices()[0].device_kind.lower()
    except Exception:
        return 512
    if "v7" in kind:
        return 512      # 64 MiB VMEM per TensorCore: keep K*tile_t temporaries modest
    return 1024         # v5e / v6e: 128 MiB VMEM; bigger tiles amortize grid overhead


@functools.partial(jax.jit,
                   static_argnames=("tile_t_max", "single_buffer_codebooks"))
def _hier_vq_forward_impl(x, embeddings, *, tile_t_max, single_buffer_codebooks):
    b, c, t = x.shape
    num_layers = len(embeddings)
    assert num_layers >= 1
    assert num_layers <= 128, "one SSE lane per layer (max 128 layers)"
    for e in embeddings:
        assert e.ndim == 2 and e.shape[1] == c, \
            "chained VQ layers require every codebook dim == C"
    code_sizes = tuple(int(e.shape[0]) for e in embeddings)
    x_itemsize = jnp.dtype(x.dtype).itemsize

    # ---- tile selection (tokens stay on lanes; NO entry/exit transposes) ----
    budget = 40 * 1024 * 1024        # leave headroom under v7x's 64 MiB physical VMEM
    if t <= tile_t_max:
        tile_t = t                   # full-extent block: no 128-alignment / padding needed
    else:
        tile_t = max(128, (tile_t_max // 128) * 128)
    while tile_t > 128 and _est_vmem_bytes(c, tile_t, code_sizes, x_itemsize) > budget:
        tile_t = max(128, (tile_t // 2) // 128 * 128)
    n_t = -(-t // tile_t)
    if b * n_t < 2 and t >= 256:
        # v7x has two TensorCores and the grid is fully "parallel": make sure
        # there are at least two grid steps so both cores get work.
        tile_t = _round_up(-(-t // 2), 128)
        n_t = -(-t // tile_t)
    t_pad = n_t * tile_t

    x_in = x if t_pad == t else jnp.pad(x, ((0, 0), (0, 0), (0, t_pad - t)))

    # ---- codebook prep (hoisted out of the kernel hot loop; tiny XLA ops) ----
    e_dists, e_gats = [], []
    for e in embeddings:
        ef = e.astype(jnp.float32)                                        # [K, C]
        esq = jnp.sum(ef * ef, axis=1, keepdims=True)                     # [K, 1]
        e_dists.append(jnp.concatenate([-2.0 * ef, esq], axis=1))         # [K, C+1]
        e_gats.append(jnp.concatenate(
            [ef.T, jnp.ones((1, ef.shape[0]), jnp.float32)], axis=0))     # [C+1, K]

    def _const_spec(shape):
        # Constant index_map -> resident codebook. Single-buffer it when allowed
        # (double-buffering data that never changes is pure VMEM waste).
        if single_buffer_codebooks:
            return pl.BlockSpec(shape, lambda bi, ti: (0,) * len(shape),
                                pipeline_mode=pl.Buffered(1))
        return pl.BlockSpec(shape, lambda bi, ti: (0,) * len(shape))

    in_specs = [pl.BlockSpec((None, c, tile_t), lambda bi, ti: (bi, 0, ti))]
    operands = [x_in]
    for e_d, e_g in zip(e_dists, e_gats):
        k = e_d.shape[0]
        in_specs.append(_const_spec((k, c + 1)))
        in_specs.append(_const_spec((c + 1, k)))
        operands.append(e_d)
        operands.append(e_g)

    vmem_limit = int(min(max(2 * _est_vmem_bytes(c, tile_t, code_sizes, x_itemsize),
                             32 * 1024 * 1024),
                         48 * 1024 * 1024))

    q_pad, sse_part = pl.pallas_call(
        _make_hier_vq_kernel(num_layers, t),
        out_shape=(
            jax.ShapeDtypeStruct((b, c, t_pad), x.dtype),
            jax.ShapeDtypeStruct((b, n_t, 1, 128), jnp.float32),
        ),
        grid_spec=pltpu.PrefetchScalarGridSpec(
            num_scalar_prefetch=0,
            grid=(b, n_t),
            in_specs=in_specs,
            out_specs=[
                pl.BlockSpec((None, c, tile_t), lambda bi, ti: (bi, 0, ti)),
                pl.BlockSpec((None, None, 1, 128), lambda bi, ti: (bi, ti, 0, 0)),
            ],
        ),
        compiler_params=pltpu.CompilerParams(
            # Every grid step owns its output tile and its own SSE row -> no
            # cross-step state -> both axes are safely "parallel" (shards
            # across v7x's two TensorCores).
            dimension_semantics=("parallel", "parallel"),
            vmem_limit_bytes=vmem_limit,
        ),
    )(*operands)

    # Reduce per-tile partial SSE (lane l holds layer l's contribution).
    sse_per_layer = jnp.sum(sse_part[:, :, 0, :num_layers], axis=(0, 1))   # [L]
    # per layer: mse(quant.detach(), x) + mse(quant, x.detach()) = 2*mean((q-x)^2)
    total_loss = 2.0 * jnp.sum(sse_per_layer) / jnp.float32(b * c * t)

    out = q_pad if t_pad == t else q_pad[:, :, :t]
    return out, total_loss


def hier_vq_forward(x: jax.Array, embeddings, *, tile_t_max: int | None = None):
    """HierVQ forward.  x: [B, C, T] (module convention); embeddings: tuple of [K_l, C]."""
    if tile_t_max is None:
        tile_t_max = _default_tile_t_max()
    try:
        return _hier_vq_forward_impl(x, tuple(embeddings),
                                     tile_t_max=int(tile_t_max),
                                     single_buffer_codebooks=True)
    except Exception:
        # Safety net: retry with default (double-buffered) codebook pipelining
        # if this JAX build rejects pl.Buffered(1) on pallas_call BlockSpecs.
        return _hier_vq_forward_impl(x, tuple(embeddings),
                                     tile_t_max=int(tile_t_max),
                                     single_buffer_codebooks=False)


def make_embeddings(key, dims, codes):
    """Deterministic codebooks, mimicking nn.Embedding.weight.uniform_(-1/K, 1/K)."""
    embs = []
    for d, k in zip(dims, codes):
        key, sub = jax.random.split(key)
        embs.append(jax.random.uniform(sub, (k, d), dtype=jnp.float32,
                                       minval=-1.0 / k, maxval=1.0 / k))
    return tuple(embs)


def _hier_vq_reference(x, embeddings):
    """Pure-JAX reference mirroring the PyTorch module's forward numerics."""
    b, c, t = x.shape
    out = x
    total = jnp.float32(0.0)
    for e in embeddings:
        flat = jnp.transpose(out, (0, 2, 1)).reshape(-1, c)
        dist = (jnp.sum(flat * flat, axis=1, keepdims=True)
                - 2.0 * flat @ e.T + jnp.sum(e * e, axis=1))
        idx = jnp.argmin(dist, axis=1)
        quant = e[idx].reshape(b, t, c).transpose(0, 2, 1)
        total = total + 2.0 * jnp.mean((quant - out) ** 2)
        out = quant
    return out, total


if __name__ == "__main__":
    # Small, module-consistent shapes: x is [B, C, T]; all layer dims == C.
    B, C, T = 2, 8, 64
    dims = [C, C]
    codes = [16, 32]

    key = jax.random.PRNGKey(0)
    key, xkey = jax.random.split(key)
    x = jax.random.normal(xkey, (B, C, T), dtype=jnp.float32)
    embeddings = make_embeddings(key, dims, codes)

    out, total_loss = hier_vq_forward(x, embeddings)
    jax.block_until_ready((out, total_loss))

    assert out.shape == (B, C, T)
    assert total_loss.shape == ()

    ref_out, ref_loss = _hier_vq_reference(x, embeddings)
    assert jnp.allclose(out, ref_out, atol=1e-4, rtol=1e-4)
    assert jnp.allclose(total_loss, ref_loss, atol=1e-5, rtol=1e-4)

    print("KERNEL_OK")
</pallas_src>

<mosaic_0001>
module attributes {stable_mosaic.version = 11 : i64} {
  func.func @kernel(%arg0: i32, %arg1: i32, %arg2: memref<1x8x64xf32, #tpu.memory_space<vmem>>, %arg3: memref<16x9xf32, #tpu.memory_space<vmem>>, %arg4: memref<9x16xf32, #tpu.memory_space<vmem>>, %arg5: memref<32x9xf32, #tpu.memory_space<vmem>>, %arg6: memref<9x32xf32, #tpu.memory_space<vmem>>, %arg7: memref<1x8x64xf32, #tpu.memory_space<vmem>>, %arg8: memref<1x1x1x128xf32, #tpu.memory_space<vmem>>) attributes {dimension_semantics = [#tpu.dimension_semantics<parallel>, #tpu.dimension_semantics<parallel>], iteration_bounds = array<i64: 2, 1>, scalar_prefetch = 0 : i64, scratch_operands = 0 : i64, tpu.core_type = #tpu.core_type<tc>, window_params = [{transform_indices = @transform_0, window_bounds = array<i64: 1, 8, 64>}, {pipeline_mode = #tpu.pipeline_mode<synchronous>, transform_indices = @transform_1, window_bounds = array<i64: 16, 9>}, {pipeline_mode = #tpu.pipeline_mode<synchronous>, transform_indices = @transform_2, window_bounds = array<i64: 9, 16>}, {pipeline_mode = #tpu.pipeline_mode<synchronous>, transform_indices = @transform_3, window_bounds = array<i64: 32, 9>}, {pipeline_mode = #tpu.pipeline_mode<synchronous>, transform_indices = @transform_4, window_bounds = array<i64: 9, 32>}, {transform_indices = @transform_5, window_bounds = array<i64: 1, 8, 64>}, {transform_indices = @transform_6, window_bounds = array<i64: 1, 1, 1, 128>}]} {
    %c0 = arith.constant 0 : index
    %c0_0 = arith.constant 0 : index
    %c0_1 = arith.constant 0 : index
    %0 = vector.load %arg2[%c0, %c0_0, %c0_1] : memref<1x8x64xf32, #tpu.memory_space<vmem>>, vector<1x8x64xf32>
    %1 = vector.shape_cast %0 : vector<1x8x64xf32> to vector<8x64xf32>
    %cst = arith.constant 1.000000e+00 : f32
    %2 = vector.broadcast %cst : f32 to vector<1x64xf32>
    %3 = tpu.concatenate %1, %2 in 0 : vector<8x64xf32>, vector<1x64xf32> -> vector<9x64xf32>
    %c64_i32 = arith.constant 64 : i32
    %4 = arith.muli %arg1, %c64_i32 : i32
    %5 = tpu.iota {dimensions = array<i32: 1>} : vector<1x64xi32>
    %6 = vector.broadcast %4 : i32 to vector<1x64xi32>
    %7 = arith.addi %6, %5 : vector<1x64xi32>
    %c64_i32_2 = arith.constant 64 : i32
    %8 = vector.broadcast %c64_i32_2 : i32 to vector<1x64xi32>
    %9 = arith.cmpi slt, %7, %8 : vector<1x64xi32>
    %10 = arith.extui %9 : vector<1x64xi1> to vector<1x64xi32>
    %11 = arith.sitofp %10 : vector<1x64xi32> to vector<1x64xf32>
    %12 = tpu.iota {dimensions = array<i32: 1>} : vector<1x128xi32>
    %cst_3 = arith.constant 0.000000e+00 : f32
    %13 = vector.broadcast %cst_3 : f32 to vector<1x128xf32>
    %c0_4 = arith.constant 0 : index
    %c0_5 = arith.constant 0 : index
    %14 = vector.load %arg3[%c0_4, %c0_5] : memref<16x9xf32, #tpu.memory_space<vmem>>, vector<16x9xf32>
    %c0_6 = arith.constant 0 : index
    %c0_7 = arith.constant 0 : index
    %15 = vector.load %arg4[%c0_6, %c0_7] : memref<9x16xf32, #tpu.memory_space<vmem>>, vector<9x16xf32>
    %cst_8 = arith.constant dense<0.000000e+00> : vector<16x64xf32>
    %16 = tpu.matmul %14, %3, %cst_8 {dimension_numbers = #tpu.dot_dimension_numbers<[1], [0], [0], [1], [0, 0, 1, 1], [], []>} : vector<16x9xf32>, vector<9x64xf32>, vector<16x64xf32> -> vector<16x64xf32>
    %cst_9 = arith.constant dense<0x7F800000> : vector<64xf32>
    %17 = vector.multi_reduction <minimumf>, %16, %cst_9 [0] : vector<16x64xf32> to vector<64xf32>
    %18 = vector.shape_cast %17 : vector<64xf32> to vector<1x64xf32>
    %19 = tpu.iota {dimensions = array<i32: 0>} : vector<16x1xi32>
    %20 = vector.broadcast %18 : vector<1x64xf32> to vector<16x64xf32>
    %21 = arith.cmpf oeq, %16, %20 : vector<16x64xf32>
    %c16_i32 = arith.constant 16 : i32
    %22 = vector.shape_cast %19 : vector<16x1xi32> to vector<16x1xi32>
    %23 = vector.broadcast %22 : vector<16x1xi32> to vector<16x64xi32>
    %24 = vector.broadcast %c16_i32 : i32 to vector<16x64xi32>
    %25 = arith.select %21, %23, %24 : vector<16x64xi1>, vector<16x64xi32>
    %cst_10 = arith.constant dense<2147483647> : vector<64xi32>
    %26 = vector.multi_reduction <minsi>, %25, %cst_10 [0] : vector<16x64xi32> to vector<64xi32>
    %27 = vector.shape_cast %26 : vector<64xi32> to vector<1x64xi32>
    %28 = vector.broadcast %19 : vector<16x1xi32> to vector<16x64xi32>
    %29 = vector.broadcast %27 : vector<1x64xi32> to vector<16x64xi32>
    %30 = arith.cmpi eq, %28, %29 : vector<16x64xi32>
    %31 = arith.extui %30 : vector<16x64xi1> to vector<16x64xi32>
    %32 = arith.sitofp %31 : vector<16x64xi32> to vector<16x64xf32>
    %cst_11 = arith.constant dense<0.000000e+00> : vector<9x64xf32>
    %33 = tpu.matmul %15, %32, %cst_11 {dimension_numbers = #tpu.dot_dimension_numbers<[1], [0], [0], [1], [0, 0, 1, 1], [], []>} : vector<9x16xf32>, vector<16x64xf32>, vector<9x64xf32> -> vector<9x64xf32>
    %34 = arith.subf %33, %3 : vector<9x64xf32>
    %35 = vector.broadcast %11 : vector<1x64xf32> to vector<9x64xf32>
    %36 = arith.mulf %34, %35 : vector<9x64xf32>
    %37 = arith.mulf %36, %36 : vector<9x64xf32>
    %38 = vector.shape_cast %37 : vector<9x64xf32> to vector<1x9x64xf32>
    %cst_12 = arith.constant dense<0.000000e+00> : vector<1xf32>
    %39 = vector.multi_reduction <add>, %38, %cst_12 [1, 2] : vector<1x9x64xf32> to vector<1xf32>
    %40 = vector.shape_cast %39 : vector<1xf32> to vector<1x1x1xf32>
    %41 = vector.extract %40[0, 0, 0] : f32 from vector<1x1x1xf32>
    %c0_i32 = arith.constant 0 : i32
    %42 = vector.broadcast %c0_i32 : i32 to vector<1x128xi32>
    %43 = arith.cmpi eq, %12, %42 : vector<1x128xi32>
    %cst_13 = arith.constant 0.000000e+00 : f32
    %44 = vector.broadcast %41 : f32 to vector<1x128xf32>
    %45 = vector.broadcast %cst_13 : f32 to vector<1x128xf32>
    %46 = arith.select %43, %44, %45 : vector<1x128xi1>, vector<1x128xf32>
    %47 = arith.addf %13, %46 : vector<1x128xf32>
    %c0_14 = arith.constant 0 : index
    %c0_15 = arith.constant 0 : index
    %48 = vector.load %arg5[%c0_14, %c0_15] : memref<32x9xf32, #tpu.memory_space<vmem>>, vector<32x9xf32>
    %c0_16 = arith.constant 0 : index
    %c0_17 = arith.constant 0 : index
    %49 = vector.load %arg6[%c0_16, %c0_17] : memref<9x32xf32, #tpu.memory_space<vmem>>, vector<9x32xf32>
    %cst_18 = arith.constant dense<0.000000e+00> : vector<32x64xf32>
    %50 = tpu.matmul %48, %33, %cst_18 {dimension_numbers = #tpu.dot_dimension_numbers<[1], [0], [0], [1], [0, 0, 1, 1], [], []>} : vector<32x9xf32>, vector<9x64xf32>, vector<32x64xf32> -> vector<32x64xf32>
    %cst_19 = arith.constant dense<0x7F800000> : vector<64xf32>
    %51 = vector.multi_reduction <minimumf>, %50, %cst_19 [0] : vector<32x64xf32> to vector<64xf32>
    %52 = vector.shape_cast %51 : vector<64xf32> to vector<1x64xf32>
    %53 = tpu.iota {dimensions = array<i32: 0>} : vector<32x1xi32>
    %54 = vector.broadcast %52 : vector<1x64xf32> to vector<32x64xf32>
    %55 = arith.cmpf oeq, %50, %54 : vector<32x64xf32>
    %c32_i32 = arith.constant 32 : i32
    %56 = vector.shape_cast %53 : vector<32x1xi32> to vector<32x1xi32>
    %57 = vector.broadcast %56 : vector<32x1xi32> to vector<32x64xi32>
    %58 = vector.broadcast %c32_i32 : i32 to vector<32x64xi32>
    %59 = arith.select %55, %57, %58 : vector<32x64xi1>, vector<32x64xi32>
    %cst_20 = arith.constant dense<2147483647> : vector<64xi32>
    %60 = vector.multi_reduction <minsi>, %59, %cst_20 [0] : vector<32x64xi32> to vector<64xi32>
    %61 = vector.shape_cast %60 : vector<64xi32> to vector<1x64xi32>
    %62 = vector.broadcast %53 : vector<32x1xi32> to vector<32x64xi32>
    %63 = vector.broadcast %61 : vector<1x64xi32> to vector<32x64xi32>
    %64 = arith.cmpi eq, %62, %63 : vector<32x64xi32>
    %65 = arith.extui %64 : vector<32x64xi1> to vector<32x64xi32>
    %66 = arith.sitofp %65 : vector<32x64xi32> to vector<32x64xf32>
    %cst_21 = arith.constant dense<0.000000e+00> : vector<9x64xf32>
    %67 = tpu.matmul %49, %66, %cst_21 {dimension_numbers = #tpu.dot_dimension_numbers<[1], [0], [0], [1], [0, 0, 1, 1], [], []>} : vector<9x32xf32>, vector<32x64xf32>, vector<9x64xf32> -> vector<9x64xf32>
    %68 = arith.subf %67, %33 : vector<9x64xf32>
    %69 = vector.broadcast %11 : vector<1x64xf32> to vector<9x64xf32>
    %70 = arith.mulf %68, %69 : vector<9x64xf32>
    %71 = arith.mulf %70, %70 : vector<9x64xf32>
    %72 = vector.shape_cast %71 : vector<9x64xf32> to vector<1x9x64xf32>
    %cst_22 = arith.constant dense<0.000000e+00> : vector<1xf32>
    %73 = vector.multi_reduction <add>, %72, %cst_22 [1, 2] : vector<1x9x64xf32> to vector<1xf32>
    %74 = vector.shape_cast %73 : vector<1xf32> to vector<1x1x1xf32>
    %75 = vector.extract %74[0, 0, 0] : f32 from vector<1x1x1xf32>
    %c1_i32 = arith.constant 1 : i32
    %76 = vector.broadcast %c1_i32 : i32 to vector<1x128xi32>
    %77 = arith.cmpi eq, %12, %76 : vector<1x128xi32>
    %cst_23 = arith.constant 0.000000e+00 : f32
    %78 = vector.broadcast %75 : f32 to vector<1x128xf32>
    %79 = vector.broadcast %cst_23 : f32 to vector<1x128xf32>
    %80 = arith.select %77, %78, %79 : vector<1x128xi1>, vector<1x128xf32>
    %81 = arith.addf %47, %80 : vector<1x128xf32>
    %82 = vector.extract_strided_slice %67 {offsets = [0, 0], sizes = [8, 64], strides = [1, 1]} : vector<9x64xf32> to vector<8x64xf32>
    %c0_24 = arith.constant 0 : index
    %c0_25 = arith.constant 0 : index
    %c0_26 = arith.constant 0 : index
    %83 = vector.load %arg7[%c0_24, %c0_25, %c0_26] : memref<1x8x64xf32, #tpu.memory_space<vmem>>, vector<1x8x64xf32>
    %84 = vector.shape_cast %83 : vector<1x8x64xf32> to vector<8x64xf32>
    %85 = vector.shape_cast %82 : vector<8x64xf32> to vector<1x8x64xf32>
    tpu.vector_store %arg7[%c0_24, %c0_25, %c0_26], %85 {strides = array<i32>} : memref<1x8x64xf32, #tpu.memory_space<vmem>>, vector<1x8x64xf32>,
    %c0_27 = arith.constant 0 : index
    %c0_28 = arith.constant 0 : index
    %c0_29 = arith.constant 0 : index
    %c0_30 = arith.constant 0 : index
    %86 = vector.load %arg8[%c0_27, %c0_28, %c0_29, %c0_30] : memref<1x1x1x128xf32, #tpu.memory_space<vmem>>, vector<1x1x1x128xf32>
    %87 = vector.shape_cast %86 : vector<1x1x1x128xf32> to vector<1x128xf32>
    %88 = vector.shape_cast %81 : vector<1x128xf32> to vector<1x1x1x128xf32>
    tpu.vector_store %arg8[%c0_27, %c0_28, %c0_29, %c0_30], %88 {strides = array<i32>} : memref<1x1x1x128xf32, #tpu.memory_space<vmem>>, vector<1x1x1x128xf32>,
    return
  }
  func.func @transform_0(%arg0: i32, %arg1: i32) -> (i32, i32, i32) {
    %c0_i32 = arith.constant 0 : i32
    %c0_i32_0 = arith.constant 0 : i32
    return %arg0, %c0_i32, %arg1 : i32, i32, i32
  }
  func.func @transform_1(%arg0: i32, %arg1: i32) -> (i32, i32) {
    %c0_i32 = arith.constant 0 : i32
    %c0_i32_0 = arith.constant 0 : i32
    %c0_i32_1 = arith.constant 0 : i32
    return %c0_i32, %c0_i32_0 : i32, i32
  }
  func.func @transform_2(%arg0: i32, %arg1: i32) -> (i32, i32) {
    %c0_i32 = arith.constant 0 : i32
    %c0_i32_0 = arith.constant 0 : i32
    %c0_i32_1 = arith.constant 0 : i32
    return %c0_i32, %c0_i32_0 : i32, i32
  }
  func.func @transform_3(%arg0: i32, %arg1: i32) -> (i32, i32) {
    %c0_i32 = arith.constant 0 : i32
    %c0_i32_0 = arith.constant 0 : i32
    %c0_i32_1 = arith.constant 0 : i32
    return %c0_i32, %c0_i32_0 : i32, i32
  }
  func.func @transform_4(%arg0: i32, %arg1: i32) -> (i32, i32) {
    %c0_i32 = arith.constant 0 : i32
    %c0_i32_0 = arith.constant 0 : i32
    %c0_i32_1 = arith.constant 0 : i32
    return %c0_i32, %c0_i32_0 : i32, i32
  }
  func.func @transform_5(%arg0: i32, %arg1: i32) -> (i32, i32, i32) {
    %c0_i32 = arith.constant 0 : i32
    %c0_i32_0 = arith.constant 0 : i32
    return %arg0, %c0_i32, %arg1 : i32, i32, i32
  }
  func.func @transform_6(%arg0: i32, %arg1: i32) -> (i32, i32, i32, i32) {
    %c0_i32 = arith.constant 0 : i32
    %c0_i32_0 = arith.constant 0 : i32
    %c0_i32_1 = arith.constant 0 : i32
    return %arg0, %arg1, %c0_i32, %c0_i32_0 : i32, i32, i32, i32
  }
}

module attributes {stable_mosaic.version = 11 : i64} {
  func.func @kernel(%arg0: i32, %arg1: i32, %arg2: memref<1x8x64xf32, #tpu.memory_space<vmem>>, %arg3: memref<16x9xf32, #tpu.memory_space<vmem>>, %arg4: memref<9x16xf32, #tpu.memory_space<vmem>>, %arg5: memref<32x9xf32, #tpu.memory_space<vmem>>, %arg6: memref<9x32xf32, #tpu.memory_space<vmem>>, %arg7: memref<1x8x64xf32, #tpu.memory_space<vmem>>, %arg8: memref<1x1x1x128xf32, #tpu.memory_space<vmem>>) attributes {dimension_semantics = [#tpu.dimension_semantics<parallel>, #tpu.dimension_semantics<parallel>], iteration_bounds = array<i64: 2, 1>, scalar_prefetch = 0 : i64, scratch_operands = 0 : i64, tpu.core_type = #tpu.core_type<tc>, window_params = [{transform_indices = @transform_0, window_bounds = array<i64: 1, 8, 64>}, {pipeline_mode = #tpu.pipeline_mode<synchronous>, transform_indices = @transform_1, window_bounds = array<i64: 16, 9>}, {pipeline_mode = #tpu.pipeline_mode<synchronous>, transform_indices = @transform_2, window_bounds = array<i64: 9, 16>}, {pipeline_mode = #tpu.pipeline_mode<synchronous>, transform_indices = @transform_3, window_bounds = array<i64: 32, 9>}, {pipeline_mode = #tpu.pipeline_mode<synchronous>, transform_indices = @transform_4, window_bounds = array<i64: 9, 32>}, {transform_indices = @transform_5, window_bounds = array<i64: 1, 8, 64>}, {transform_indices = @transform_6, window_bounds = array<i64: 1, 1, 1, 128>}]} {
    %c0 = arith.constant 0 : index
    %c0_0 = arith.constant 0 : index
    %c0_1 = arith.constant 0 : index
    %0 = vector.load %arg2[%c0, %c0_0, %c0_1] : memref<1x8x64xf32, #tpu.memory_space<vmem>>, vector<1x8x64xf32>
    %1 = vector.shape_cast %0 : vector<1x8x64xf32> to vector<8x64xf32>
    %cst = arith.constant 1.000000e+00 : f32
    %2 = vector.broadcast %cst : f32 to vector<1x64xf32>
    %3 = tpu.concatenate %1, %2 in 0 : vector<8x64xf32>, vector<1x64xf32> -> vector<9x64xf32>
    %c64_i32 = arith.constant 64 : i32
    %4 = arith.muli %arg1, %c64_i32 : i32
    %5 = tpu.iota {dimensions = array<i32: 1>} : vector<1x64xi32>
    %6 = vector.broadcast %4 : i32 to vector<1x64xi32>
    %7 = arith.addi %6, %5 : vector<1x64xi32>
    %c64_i32_2 = arith.constant 64 : i32
    %8 = vector.broadcast %c64_i32_2 : i32 to vector<1x64xi32>
    %9 = arith.cmpi slt, %7, %8 : vector<1x64xi32>
    %10 = arith.extui %9 : vector<1x64xi1> to vector<1x64xi32>
    %11 = arith.sitofp %10 : vector<1x64xi32> to vector<1x64xf32>
    %12 = tpu.iota {dimensions = array<i32: 1>} : vector<1x128xi32>
    %cst_3 = arith.constant 0.000000e+00 : f32
    %13 = vector.broadcast %cst_3 : f32 to vector<1x128xf32>
    %c0_4 = arith.constant 0 : index
    %c0_5 = arith.constant 0 : index
    %14 = vector.load %arg3[%c0_4, %c0_5] : memref<16x9xf32, #tpu.memory_space<vmem>>, vector<16x9xf32>
    %c0_6 = arith.constant 0 : index
    %c0_7 = arith.constant 0 : index
    %15 = vector.load %arg4[%c0_6, %c0_7] : memref<9x16xf32, #tpu.memory_space<vmem>>, vector<9x16xf32>
    %cst_8 = arith.constant dense<0.000000e+00> : vector<16x64xf32>
    %16 = tpu.matmul %14, %3, %cst_8 {dimension_numbers = #tpu.dot_dimension_numbers<[1], [0], [0], [1], [0, 0, 1, 1], [], []>} : vector<16x9xf32>, vector<9x64xf32>, vector<16x64xf32> -> vector<16x64xf32>
    %cst_9 = arith.constant dense<0x7F800000> : vector<64xf32>
    %17 = vector.multi_reduction <minimumf>, %16, %cst_9 [0] : vector<16x64xf32> to vector<64xf32>
    %18 = vector.shape_cast %17 : vector<64xf32> to vector<1x64xf32>
    %19 = tpu.iota {dimensions = array<i32: 0>} : vector<16x1xi32>
    %20 = vector.broadcast %18 : vector<1x64xf32> to vector<16x64xf32>
    %21 = arith.cmpf oeq, %16, %20 : vector<16x64xf32>
    %c16_i32 = arith.constant 16 : i32
    %22 = vector.shape_cast %19 : vector<16x1xi32> to vector<16x1xi32>
    %23 = vector.broadcast %22 : vector<16x1xi32> to vector<16x64xi32>
    %24 = vector.broadcast %c16_i32 : i32 to vector<16x64xi32>
    %25 = arith.select %21, %23, %24 : vector<16x64xi1>, vector<16x64xi32>
    %cst_10 = arith.constant dense<2147483647> : vector<64xi32>
    %26 = vector.multi_reduction <minsi>, %25, %cst_10 [0] : vector<16x64xi32> to vector<64xi32>
    %27 = vector.shape_cast %26 : vector<64xi32> to vector<1x64xi32>
    %28 = vector.broadcast %19 : vector<16x1xi32> to vector<16x64xi32>
    %29 = vector.broadcast %27 : vector<1x64xi32> to vector<16x64xi32>
    %30 = arith.cmpi eq, %28, %29 : vector<16x64xi32>
    %31 = arith.extui %30 : vector<16x64xi1> to vector<16x64xi32>
    %32 = arith.sitofp %31 : vector<16x64xi32> to vector<16x64xf32>
    %cst_11 = arith.constant dense<0.000000e+00> : vector<9x64xf32>
    %33 = tpu.matmul %15, %32, %cst_11 {dimension_numbers = #tpu.dot_dimension_numbers<[1], [0], [0], [1], [0, 0, 1, 1], [], []>} : vector<9x16xf32>, vector<16x64xf32>, vector<9x64xf32> -> vector<9x64xf32>
    %34 = arith.subf %33, %3 : vector<9x64xf32>
    %35 = vector.broadcast %11 : vector<1x64xf32> to vector<9x64xf32>
    %36 = arith.mulf %34, %35 : vector<9x64xf32>
    %37 = arith.mulf %36, %36 : vector<9x64xf32>
    %38 = vector.shape_cast %37 : vector<9x64xf32> to vector<1x9x64xf32>
    %cst_12 = arith.constant dense<0.000000e+00> : vector<1xf32>
    %39 = vector.multi_reduction <add>, %38, %cst_12 [1, 2] : vector<1x9x64xf32> to vector<1xf32>
    %40 = vector.shape_cast %39 : vector<1xf32> to vector<1x1x1xf32>
    %41 = vector.extract %40[0, 0, 0] : f32 from vector<1x1x1xf32>
    %c0_i32 = arith.constant 0 : i32
    %42 = vector.broadcast %c0_i32 : i32 to vector<1x128xi32>
    %43 = arith.cmpi eq, %12, %42 : vector<1x128xi32>
    %cst_13 = arith.constant 0.000000e+00 : f32
    %44 = vector.broadcast %41 : f32 to vector<1x128xf32>
    %45 = vector.broadcast %cst_13 : f32 to vector<1x128xf32>
    %46 = arith.select %43, %44, %45 : vector<1x128xi1>, vector<1x128xf32>
    %47 = arith.addf %13, %46 : vector<1x128xf32>
    %c0_14 = arith.constant 0 : index
    %c0_15 = arith.constant 0 : index
    %48 = vector.load %arg5[%c0_14, %c0_15] : memref<32x9xf32, #tpu.memory_space<vmem>>, vector<32x9xf32>
    %c0_16 = arith.constant 0 : index
    %c0_17 = arith.constant 0 : index
    %49 = vector.load %arg6[%c0_16, %c0_17] : memref<9x32xf32, #tpu.memory_space<vmem>>, vector<9x32xf32>
    %cst_18 = arith.constant dense<0.000000e+00> : vector<32x64xf32>
    %50 = tpu.matmul %48, %33, %cst_18 {dimension_numbers = #tpu.dot_dimension_numbers<[1], [0], [0], [1], [0, 0, 1, 1], [], []>} : vector<32x9xf32>, vector<9x64xf32>, vector<32x64xf32> -> vector<32x64xf32>
    %cst_19 = arith.constant dense<0x7F800000> : vector<64xf32>
    %51 = vector.multi_reduction <minimumf>, %50, %cst_19 [0] : vector<32x64xf32> to vector<64xf32>
    %52 = vector.shape_cast %51 : vector<64xf32> to vector<1x64xf32>
    %53 = tpu.iota {dimensions = array<i32: 0>} : vector<32x1xi32>
    %54 = vector.broadcast %52 : vector<1x64xf32> to vector<32x64xf32>
    %55 = arith.cmpf oeq, %50, %54 : vector<32x64xf32>
    %c32_i32 = arith.constant 32 : i32
    %56 = vector.shape_cast %53 : vector<32x1xi32> to vector<32x1xi32>
    %57 = vector.broadcast %56 : vector<32x1xi32> to vector<32x64xi32>
    %58 = vector.broadcast %c32_i32 : i32 to vector<32x64xi32>
    %59 = arith.select %55, %57, %58 : vector<32x64xi1>, vector<32x64xi32>
    %cst_20 = arith.constant dense<2147483647> : vector<64xi32>
    %60 = vector.multi_reduction <minsi>, %59, %cst_20 [0] : vector<32x64xi32> to vector<64xi32>
    %61 = vector.shape_cast %60 : vector<64xi32> to vector<1x64xi32>
    %62 = vector.broadcast %53 : vector<32x1xi32> to vector<32x64xi32>
    %63 = vector.broadcast %61 : vector<1x64xi32> to vector<32x64xi32>
    %64 = arith.cmpi eq, %62, %63 : vector<32x64xi32>
    %65 = arith.extui %64 : vector<32x64xi1> to vector<32x64xi32>
    %66 = arith.sitofp %65 : vector<32x64xi32> to vector<32x64xf32>
    %cst_21 = arith.constant dense<0.000000e+00> : vector<9x64xf32>
    %67 = tpu.matmul %49, %66, %cst_21 {dimension_numbers = #tpu.dot_dimension_numbers<[1], [0], [0], [1], [0, 0, 1, 1], [], []>} : vector<9x32xf32>, vector<32x64xf32>, vector<9x64xf32> -> vector<9x64xf32>
    %68 = arith.subf %67, %33 : vector<9x64xf32>
    %69 = vector.broadcast %11 : vector<1x64xf32> to vector<9x64xf32>
    %70 = arith.mulf %68, %69 : vector<9x64xf32>
    %71 = arith.mulf %70, %70 : vector<9x64xf32>
    %72 = vector.shape_cast %71 : vector<9x64xf32> to vector<1x9x64xf32>
    %cst_22 = arith.constant dense<0.000000e+00> : vector<1xf32>
    %73 = vector.multi_reduction <add>, %72, %cst_22 [1, 2] : vector<1x9x64xf32> to vector<1xf32>
    %74 = vector.shape_cast %73 : vector<1xf32> to vector<1x1x1xf32>
    %75 = vector.extract %74[0, 0, 0] : f32 from vector<1x1x1xf32>
    %c1_i32 = arith.constant 1 : i32
    %76 = vector.broadcast %c1_i32 : i32 to vector<1x128xi32>
    %77 = arith.cmpi eq, %12, %76 : vector<1x128xi32>
    %cst_23 = arith.constant 0.000000e+00 : f32
    %78 = vector.broadcast %75 : f32 to vector<1x128xf32>
    %79 = vector.broadcast %cst_23 : f32 to vector<1x128xf32>
    %80 = arith.select %77, %78, %79 : vector<1x128xi1>, vector<1x128xf32>
    %81 = arith.addf %47, %80 : vector<1x128xf32>
    %82 = vector.extract_strided_slice %67 {offsets = [0, 0], sizes = [8, 64], strides = [1, 1]} : vector<9x64xf32> to vector<8x64xf32>
    %c0_24 = arith.constant 0 : index
    %c0_25 = arith.constant 0 : index
    %c0_26 = arith.constant 0 : index
    %83 = vector.load %arg7[%c0_24, %c0_25, %c0_26] : memref<1x8x64xf32, #tpu.memory_space<vmem>>, vector<1x8x64xf32>
    %84 = vector.shape_cast %83 : vector<1x8x64xf32> to vector<8x64xf32>
    %85 = vector.shape_cast %82 : vector<8x64xf32> to vector<1x8x64xf32>
    tpu.vector_store %arg7[%c0_24, %c0_25, %c0_26], %85 {strides = array<i32>} : memref<1x8x64xf32, #tpu.memory_space<vmem>>, vector<1x8x64xf32>,
    %c0_27 = arith.constant 0 : index
    %c0_28 = arith.constant 0 : index
    %c0_29 = arith.constant 0 : index
    %c0_30 = arith.constant 0 : index
    %86 = vector.load %arg8[%c0_27, %c0_28, %c0_29, %c0_30] : memref<1x1x1x128xf32, #tpu.memory_space<vmem>>, vector<1x1x1x128xf32>
    %87 = vector.shape_cast %86 : vector<1x1x1x128xf32> to vector<1x128xf32>
    %88 = vector.shape_cast %81 : vector<1x128xf32> to vector<1x1x1x128xf32>
    tpu.vector_store %arg8[%c0_27, %c0_28, %c0_29, %c0_30], %88 {strides = array<i32>} : memref<1x1x1x128xf32, #tpu.memory_space<vmem>>, vector<1x1x1x128xf32>,
    return
  }
  func.func @transform_0(%arg0: i32, %arg1: i32) -> (i32, i32, i32) {
    %c0_i32 = arith.constant 0 : i32
    %c0_i32_0 = arith.constant 0 : i32
    return %arg0, %c0_i32, %arg1 : i32, i32, i32
  }
  func.func @transform_1(%arg0: i32, %arg1: i32) -> (i32, i32) {
    %c0_i32 = arith.constant 0 : i32
    %c0_i32_0 = arith.constant 0 : i32
    %c0_i32_1 = arith.constant 0 : i32
    return %c0_i32, %c0_i32_0 : i32, i32
  }
  func.func @transform_2(%arg0: i32, %arg1: i32) -> (i32, i32) {
    %c0_i32 = arith.constant 0 : i32
    %c0_i32_0 = arith.constant 0 : i32
    %c0_i32_1 = arith.constant 0 : i32
    return %c0_i32, %c0_i32_0 : i32, i32
  }
  func.func @transform_3(%arg0: i32, %arg1: i32) -> (i32, i32) {
    %c0_i32 = arith.constant 0 : i32
    %c0_i32_0 = arith.constant 0 : i32
    %c0_i32_1 = arith.constant 0 : i32
    return %c0_i32, %c0_i32_0 : i32, i32
  }
  func.func @transform_4(%arg0: i32, %arg1: i32) -> (i32, i32) {
    %c0_i32 = arith.constant 0 : i32
    %c0_i32_0 = arith.constant 0 : i32
    %c0_i32_1 = arith.constant 0 : i32
    return %c0_i32, %c0_i32_0 : i32, i32
  }
  func.func @transform_5(%arg0: i32, %arg1: i32) -> (i32, i32, i32) {
    %c0_i32 = arith.constant 0 : i32
    %c0_i32_0 = arith.constant 0 : i32
    return %arg0, %c0_i32, %arg1 : i32, i32, i32
  }
  func.func @transform_6(%arg0: i32, %arg1: i32) -> (i32, i32, i32, i32) {
    %c0_i32 = arith.constant 0 : i32
    %c0_i32_0 = arith.constant 0 : i32
    %c0_i32_1 = arith.constant 0 : i32
    return %arg0, %arg1, %c0_i32, %c0_i32_0 : i32, i32, i32, i32
  }
}

</mosaic_0001>

<bundles_post_ra>
// kernel: _hier_vq_forward_impl.1
= control target key start
LH: loop header
LB: loop body
LE: loop exit
PB: predicated region body
PF: predicated region fallthrough
CT: control target
= control target key end

     0   :  { %12 = vsyncpa [#allocation3], 0  ;;  %s1409_s0 = inlined_call_operand.vmem [shape: f32[2,8,64], index: 0, kind: input, shape index: {}]   ;;  %s1410_s1 = inlined_call_operand.vmem [shape: f32[16,9], index: 1, kind: input, shape index: {}]   ;;  %s1411_s2 = inlined_call_operand.vmem [shape: f32[9,16], index: 2, kind: input, shape index: {}]   ;;  %s1412_s3 = inlined_call_operand.vmem [shape: f32[32,9], index: 3, kind: input, shape index: {}]   ;;  %s1413_s4 = inlined_call_operand.vmem [shape: f32[9,32], index: 4, kind: input, shape index: {}]   ;;  %s1414_s5 = inlined_call_operand.hbm [shape: f32[2,8,64], index: 5, kind: output, shape index: {0}]   ;;  %s1415_s6 = inlined_call_operand.vmem [shape: f32[2,1,1,128], index: 6, kind: output, shape index: {1}]  }
   0x1   :  { %14 = vsyncpa [#allocation3 + $0x1], 0  ;;  %s1185_s21 = smov 0   ;;  %s1187_s22 = smov 0  }
   0x2   :  { %s1189_s23 = smov 0   ;;  %s1191_s24 = smov 0  }
   0x3   :  { %s1193_s25 = smov 0   ;;  %s1195_s26 = smov 0  }
   0x4 LB: > { %s916_s27 = sadd.s32 4294967295, %s1145_s26   ;;  %s917_s28 = sadd.s32 4294967294, %s1145_s26   ;;  %s1145_s26 = sphi %s1195_s26, %s20_s26   ;;  %s1141_s25 = sphi %s1193_s25, %s1422_s25   ;;  %s1137_s24 = sphi %s1191_s24, %s1421_s24   ;;  %s1133_s23 = sphi %s1189_s23, %s1420_s23   ;;  %s1129_s22 = sphi %s1187_s22, %s1419_s22   ;;  %s1125_s21 = sphi %s1185_s21, %s1418_s21  }
   0x5   : > { %s32_s29 = sadd.s32 1, %s1141_s25  ;;  %s153_s30 = sadd.s32 1, %s1133_s23 }
   0x6   : > { %p34_p0 = scmp.ge.s32.totalorder %s32_s29, 2  ;;  %p163_p1 = scmp.ne.s32.totalorder %s1133_s23, %s1129_s22 }
   0x7   : > { %p164_p2 = scmp.eq.s32.totalorder %s916_s27, 1  ;;  %p169_p3 = scmp.ne.s32.totalorder %s1129_s22, %s1125_s21 }
   0x8   : > { %s1424_s29 = smov (%p34_p0, %s32_s29), 0  ;;  %p170_p5 = scmp.eq.s32.totalorder %s917_s28, 1 }
   0x9   : > { %p1225_p4 = por %p164_p2, %p163_p1  ;;  %s148_s8 = ssub.s32 %s1141_s25, %s1424_s29 }
   0xa   : > { %p920_p6 = scmp.ge.s32.totalorder %s1145_s26, 1  ;;  %p151_p7 = scmp.eq.s32.totalorder %s148_s8, 0 }
   0xb   : > { %p1232_p8 = por %p170_p5, %p169_p3  ;;  %p238_p9 = scmp.lt.s32.totalorder %s1145_s26, 3 }
   0xc   : > { %s1238_s10 = scalar_select %p151_p7, %s1133_s23, %s153_s30  }
   0xd   : > { %p239_p10 = pnand %p920_p6, %p238_p9 }
   0xe   : > { %p276_p11 = scmp.lt.s32.totalorder (!%p239_p10), %s1137_s24, 1  ;;  %s265_s30 = sand.u32 (!%p239_p10), 1, %s1129_s22  }
   0xf   : > { %242 = sbr.rel (%p239_p10) target bundleno = 1110 (0x456), region = 40  ;;  %s921_s8 = sshll.u32 (!%p239_p10), %s265_s30, 3 }
  0x10   : > { %s267_s11 = scalar_lea.vmem (!%p239_p10), [#allocation2], %s921_s8  ;;  %s950_s12 = sshll.u32 (!%p239_p10), %s1137_s24, 7 }
  0x11   : > { %s796_s18 = scalar_lea.sflag (!%p239_p10), [#allocation3], %s265_s30  ;;  %s1149_s20 = smov (!%p239_p10), [#allocation2]  }
  0x12   : > { %s1073_s27 = sshll.u32 (!%p239_p10), %s1149_s20, 4  ;;  %s1074_s27 = int_to_ptr.vmem [resolvable:$false] %s1073_s27 }
  0x13   : > { %s1075_s28 = scalar_lea.vmem (!%p239_p10), %s1074_s27, 256 }
  0x14   : > { %vm309_vm0 = vcmask 1040384   ;;  %v298_v0 = vld [vmem:[%s1410_s1] sm:$0xff]  ;;  %vm302_vm1 = vcmask 72704   ;;  %v1147_v1 = vmov 1.0   ;;  %s1250_s13 = scalar_select %p276_p11, %s1137_s24, 1  ;;  %v299_v3 = vld [vmem:[%s1410_s1 + $0x8] sm:$0xff]  ;;  %v291_v11 = vlaneseq }
  0x15   : > { %973 = vmatprep.subr.msk.mxu0 %vm309_vm0, %v1147_v1  ;;  %977 = vmatprep.mubr.msk.f32.mxu0 %vm302_vm1, %v298_v0  ;;  %v300_v4 = vld [vmem:[%s1411_s2] sm:$0xff]  ;;  %vm424_vm2 = vcmask 130048   ;;  %vm388_vm3 = vcmask 523264   ;;  %v301_v30 = vld [vmem:[%s1411_s2 + $0x8] sm:$0x1]  ;;  %v1148_v34 = vmov 0.0  }
  0x16   : > { %974 = vmatpush3.msk.msra.mxu0 %vm309_vm0, %v1147_v1  ;;  %s922_s14 = sshll.u32 %s1250_s13, 3  ;;  %984 = vmatprep.mubr.msk.f32.mxu1 %vm424_vm2, %v300_v4  ;;  %v1270_v14 = vshrl.u32 %v291_v11, 7  ;;  %v529_v31 = vld [vmem:[%s1412_s3] sm:$0xff]  ;;  %v1293_v32 = vand.u32 127, %v291_v11  ;;  %v530_v38 = vld [vmem:[%s1412_s3 + $0x8] sm:$0xff]  ;;  %v531_v39 = vld [vmem:[%s1412_s3 + $0x10] sm:$0xff] }
  0x17   : > { %s282_s17 = scalar_lea.vmem %s1409_s0, %s922_s14  ;;  %v532_v44 = vld [vmem:[%s1412_s3 + $0x18] sm:$0xff]  ;;  %vm513_vm13 = vcmask 516096   ;;  %v533_v49 = vld [vmem:[%s1413_s4] sm:$0xff]  ;;  %vm689_vm14 = vcmask 261120   ;;  %s816_s14 = sshll.u32 %s267_s11, 4  ;;  %s817_s14 = int_to_ptr.vmem [resolvable:$true] %s816_s14 }
  0x18   : > { %v1256_v2 = vld [vmem:[%s282_s17] sm:$0xff]  ;;  %v1273_v17 = vadd.s32 8, %v1270_v14  ;;  %vm295_vm12 = vcmp.lt.s32.totalorder %v1293_v32, 64  ;;  %v649_v11 = vadd.s32 24, %v1270_v14  ;;  %s814_s17 = scalar_lea.hbm %s1414_s5, %s950_s12  ;;  %s1069_s19 = scalar_lea.vmem %s817_s14, 128 }
  0x19   : > { %975 = vmatprep.subr.mxu0 %v1256_v2  ;;  %v1298_v35 = vsel %vm295_vm12, 1.0, %v1148_v34  ;;  %v534_v34 = vld [vmem:[%s1413_s4 + $0x8] sm:$0x1]  ;;  %p1070_p12 = scmp.ne.s32.totalorder %s817_s14, %s1069_s19  ;;  %p1076_p1 = scmp.lt.s32.totalorder %s817_s14, %s1074_s27 }
  0x1a   : > { %976 = vmatpush3.msra.mxu0 %v1256_v2  ;;  %p1077_p2 = scmp.lt.s32.totalorder %s1075_s28, %s1069_s19 }
  0x1b   : > { %978 = vmatmul.mubr.msk.f32.vlgmr.msra.gmra.mxu0 %vm302_vm1, %v299_v3  ;;  %p1071_p13 = pnand %p1070_p12, %p1225_p4 }
  0x1c   : > { %991 = vmatprep.mubr.msk.f32.mxu0 %vm302_vm1, %v529_v31  ;;  %p1078_p3 = por %p1077_p2, %p1076_p1 }
  0x1d   : > { %p1072_p0 = pneg %p1071_p13 }
  0x1f   : > { %p1079_p5 = pnand %p1078_p3, %p1072_p0 }
  0xdb   : > { %v979_v5 = vpop.f32.mrf.mxu0 }
  0xdc   : > { %v390_v7 = vsel %vm388_vm3, %v979_v5, inf }
  0xdd   : > { %v379_v6 = vpop.f32.mrf.mxu0 }
  0xde   : > { %v389_v8 = vsel %vm388_vm3, %v379_v6, inf }
  0xdf   : > { %v391_v9 = vmin.f32 %v389_v8, %v390_v7 }
  0xe1   : > { %v392_v10 = vrot.slane %v391_v9, 4 }
  0xe3   : > { %v393_v12 = vmin.f32 %v391_v9, %v392_v10  ;;  %v648_v10 = vadd.s32 16, %v1270_v14 }
  0xe5   : > { %v394_v13 = vrot.slane %v393_v12, 2 }
  0xe7   : > { %v395_v15 = vmin.f32 %v393_v12, %v394_v13 }
  0xe9   : > { %v396_v16 = vrot.slane %v395_v15, 1 }
  0xeb   : > { %v397_v18 = vmin.f32 %v395_v15, %v396_v16 }
  0xed   : > { %vm401_vm4 = vcmp.eq.f32.partialorder %v379_v6, %v397_v18  ;;  %vm402_vm5 = vcmp.eq.f32.partialorder %v979_v5, %v397_v18 }
  0xee   : > { %v403_v19 = vsel %vm401_vm4, %v1270_v14, 16  ;;  %v404_v20 = vsel %vm402_vm5, %v1273_v17, 16 }
  0xef   : > { %v405_v21 = vsel %vm388_vm3, %v403_v19, 2147483647  ;;  %v406_v22 = vsel %vm388_vm3, %v404_v20, 2147483647 }
  0xf0   : > { %vm407_vm6 = vcmp.lt.s32.totalorder %v405_v21, %v406_v22 }
  0xf1   : > { %v408_v23 = vsel %vm407_vm6, %v405_v21, %v406_v22 }
  0xf2   : > { %v409_v24 = vrot.slane %v408_v23, 4 }
  0xf4   : > { %vm410_vm7 = vcmp.lt.s32.totalorder %v408_v23, %v409_v24 }
  0xf5   : > { %v411_v25 = vsel %vm410_vm7, %v408_v23, %v409_v24 }
  0xf6   : > { %v412_v26 = vrot.slane %v411_v25, 2 }
  0xf8   : > { %vm413_vm8 = vcmp.lt.s32.totalorder %v411_v25, %v412_v26 }
  0xf9   : > { %v414_v27 = vsel %vm413_vm8, %v411_v25, %v412_v26 }
  0xfa   : > { %v415_v28 = vrot.slane %v414_v27, 1 }
  0xfc   : > { %vm416_vm9 = vcmp.lt.s32.totalorder %v414_v27, %v415_v28 }
  0xfd   : > { %v417_v29 = vsel %vm416_vm9, %v414_v27, %v415_v28 }
  0xfe   : > { %vm419_vm10 = vcmp.eq.s32.totalorder %v1273_v17, %v417_v29  ;;  %vm418_vm11 = vcmp.eq.s32.totalorder %v1270_v14, %v417_v29 }
  0xff   : > { %980 = vmatprep.subr.msk.mxu1 %vm419_vm10, %v1147_v1 }
 0x100   : > { %981 = vmatpush3.msk.msra.mxu1 %vm419_vm10, %v1147_v1 }
 0x101   : > { %982 = vmatprep.subr.msk.mxu1 %vm418_vm11, %v1147_v1 }
 0x102   : > { %983 = vmatpush3.msk.msra.mxu1 %vm418_vm11, %v1147_v1 }
 0x103   : > { %985 = vmatmul.mubr.msk.f32.vlgmr.msra.gmra.mxu1 %vm424_vm2, %v301_v30 }
 0x104   : > { %1005 = vmatprep.mubr.msk.f32.mxu1 %vm689_vm14, %v533_v49 }
 0x1c3   : > { %v1296_v33 = vpop.f32.mrf.mxu1 }
 0x1c4   : > { %987 = vmatprep.subr.msk.mxu0 %vm309_vm0, %v1296_v33  ;;  %v933_v36 = vadd.f32 -1.0, %v1296_v33 }
 0x1c5   : > { %v1303_v37 = vpop.f32.mrf.mxu1  ;;  %988 = vmatpush3.msk.msra.mxu0 %vm309_vm0, %v1296_v33 }
 0x1c6   : > { %989 = vmatprep.subr.mxu0 %v1303_v37  ;;  %v506_v40 = vsub.f32 %v1303_v37, %v1256_v2  ;;  %v509_v41 = vmul.f32 %v933_v36, %v1298_v35 }
 0x1c7   : > { %990 = vmatpush3.msra.mxu0 %v1303_v37 }
 0x1c8   : > { %992 = vmatmul.mubr.msk.f32.vlgmr.msra.gmra.mxu0 %vm302_vm1, %v530_v38  ;;  %v508_v42 = vmul.f32 %v1298_v35, %v506_v40  ;;  %v511_v43 = vmul.f32 %v509_v41, %v509_v41 }
 0x1c9   : > { %994 = vmatprep.mubr.msk.f32.mxu0 %vm302_vm1, %v531_v39 }
 0x1ca   : > { %v510_v45 = vmul.f32 %v508_v42, %v508_v42  ;;  %v514_v47 = vsel %vm513_vm13, %v511_v43, 0.0 }
 0x1cc   : > { %995 = vmatmul.mubr.msk.f32.gmra.mxu0 %vm302_vm1, %v532_v44  ;;  %v512_v46 = vsel %vm388_vm3, %v510_v45, 0.0 }
 0x1cd   : > { %v515_v48 = vadd.f32 %v514_v47, %v512_v46 }
 0x1cf   : > { %516 = vadd.xlane.f32.xlu0 %v515_v48 }
 0x258   : > { %v517_v50 = vpop.xlane.xlu0 %516 }
 0x259   : > { %v518_v51 = vrot.slane %v517_v50, 4 }
 0x25b   : > { %v519_v52 = vadd.f32 %v518_v51, %v517_v50 }
 0x25d   : > { %v520_v53 = vrot.slane %v519_v52, 2 }
 0x25f   : > { %v521_v54 = vadd.f32 %v520_v53, %v519_v52 }
 0x261   : > { %v522_v55 = vrot.slane %v521_v54, 1 }
 0x263   : > { %v523_v56 = vadd.f32 %v522_v55, %v521_v54 }
 0x265   : > { %1008 = vpush %v523_v56 }
 0x288   : > { %v993_v57 = vpop.f32.mrf.mxu0 }
 0x289   : > { %v636_v62 = vsel %vm388_vm3, %v993_v57, inf }
 0x28a   : > { %v616_v58 = vpop.f32.mrf.mxu0 }
 0x28b   : > { %v635_v60 = vsel %vm388_vm3, %v616_v58, inf }
 0x28c   : > { %v996_v59 = vpop.f32.mrf.mxu0  ;;  %v639_v2 = vmin.f32 %v635_v60, %v636_v62 }
 0x28d   : > { %v638_v63 = vsel %vm388_vm3, %v996_v59, inf }
 0x28e   : > { %v626_v61 = vpop.f32.mrf.mxu0 }
 0x28f   : > { %v637_v0 = vsel %vm388_vm3, %v626_v61, inf }
 0x290   : > { %v640_v3 = vmin.f32 %v637_v0, %v638_v63 }
 0x292   : > { %v641_v4 = vmin.f32 %v639_v2, %v640_v3 }
 0x294   : > { %v642_v5 = vrot.slane %v641_v4, 4 }
 0x296   : > { %v643_v6 = vmin.f32 %v641_v4, %v642_v5 }
 0x298   : > { %v644_v7 = vrot.slane %v643_v6, 2 }
 0x29a   : > { %v645_v8 = vmin.f32 %v643_v6, %v644_v7 }
 0x29c   : > { %v646_v9 = vrot.slane %v645_v8, 1 }
 0x29e   : > { %v647_v12 = vmin.f32 %v645_v8, %v646_v9 }
 0x2a0   : > { %vm650_vm15 = vcmp.eq.f32.partialorder %v616_v58, %v647_v12  ;;  %vm651_vm0 = vcmp.eq.f32.partialorder %v993_v57, %v647_v12  ;;  %vm652_vm1 = vcmp.eq.f32.partialorder %v626_v61, %v647_v12  ;;  %vm653_vm2 = vcmp.eq.f32.partialorder %v996_v59, %v647_v12 }
 0x2a1   : > { %v654_v13 = vsel %vm650_vm15, %v1270_v14, 32  ;;  %v655_v15 = vsel %vm651_vm0, %v1273_v17, 32  ;;  %v656_v16 = vsel %vm652_vm1, %v648_v10, 32  ;;  %v657_v18 = vsel %vm653_vm2, %v649_v11, 32 }
 0x2a2   : > { %v658_v19 = vsel %vm388_vm3, %v654_v13, 2147483647  ;;  %v659_v20 = vsel %vm388_vm3, %v655_v15, 2147483647  ;;  %v660_v21 = vsel %vm388_vm3, %v656_v16, 2147483647 }
 0x2a3   : > { %v661_v22 = vsel %vm388_vm3, %v657_v18, 2147483647  ;;  %vm662_vm4 = vcmp.lt.s32.totalorder %v658_v19, %v659_v20 }
 0x2a4   : > { %v663_v23 = vsel %vm662_vm4, %v658_v19, %v659_v20  ;;  %vm664_vm5 = vcmp.lt.s32.totalorder %v660_v21, %v661_v22 }
 0x2a5   : > { %v665_v24 = vsel %vm664_vm5, %v660_v21, %v661_v22 }
 0x2a6   : > { %vm666_vm6 = vcmp.lt.s32.totalorder %v663_v23, %v665_v24 }
 0x2a7   : > { %v667_v25 = vsel %vm666_vm6, %v663_v23, %v665_v24 }
 0x2a8   : > { %v668_v26 = vrot.slane %v667_v25, 4 }
 0x2aa   : > { %vm669_vm7 = vcmp.lt.s32.totalorder %v667_v25, %v668_v26 }
 0x2ab   : > { %v670_v27 = vsel %vm669_vm7, %v667_v25, %v668_v26 }
 0x2ac   : > { %v671_v28 = vrot.slane %v670_v27, 2 }
 0x2ae   : > { %vm672_vm8 = vcmp.lt.s32.totalorder %v670_v27, %v671_v28 }
 0x2af   : > { %v673_v29 = vsel %vm672_vm8, %v670_v27, %v671_v28 }
 0x2b0   : > { %v674_v30 = vrot.slane %v673_v29, 1 }
 0x2b2   : > { %vm675_vm9 = vcmp.lt.s32.totalorder %v673_v29, %v674_v30 }
 0x2b3   : > { %v676_v31 = vsel %vm675_vm9, %v673_v29, %v674_v30 }
 0x2b4   : > { %vm680_vm10 = vcmp.eq.s32.totalorder %v649_v11, %v676_v31  ;;  %vm679_vm11 = vcmp.eq.s32.totalorder %v648_v10, %v676_v31  ;;  %vm678_vm12 = vcmp.eq.s32.totalorder %v1273_v17, %v676_v31  ;;  %vm677_vm15 = vcmp.eq.s32.totalorder %v1270_v14, %v676_v31 }
 0x2b5   : > { %997 = vmatprep.subr.msk.mxu1 %vm680_vm10, %v1147_v1 }
 0x2b6   : > { %998 = vmatpush3.msk.msra.mxu1 %vm680_vm10, %v1147_v1 }
 0x2b7   : > { %999 = vmatprep.subr.msk.mxu1 %vm679_vm11, %v1147_v1 }
 0x2b8   : > { %1000 = vmatpush3.msk.msra.mxu1 %vm679_vm11, %v1147_v1 }
 0x2b9   : > { %1001 = vmatprep.subr.msk.mxu1 %vm678_vm12, %v1147_v1 }
 0x2ba   : > { %1002 = vmatpush3.msk.msra.mxu1 %vm678_vm12, %v1147_v1 }
 0x2bb   : > { %1003 = vmatprep.subr.msk.mxu1 %vm677_vm15, %v1147_v1 }
 0x2bc   : > { %1004 = vmatpush3.msk.msra.mxu1 %vm677_vm15, %v1147_v1 }
 0x2bd   : > { %1006 = vmatmul.mubr.msk.f32.vlgmr.msra.gmra.mxu1 %vm689_vm14, %v534_v34 }
 0x37d   : > { %v1007_v17 = vpop.f32.mrf.mxu1 }
 0x37e   : > { %v772_v36 = vsub.f32 %v1007_v17, %v1296_v33 }
 0x37f   : > { %v762_v38 = vpop.f32.mrf.mxu1 }
 0x380   : > { %v774_v39 = vmul.f32 %v1298_v35, %v772_v36  ;;  %v771_v14 = vsub.f32 %v762_v38, %v1303_v37  ;;  %793 = vst.msk [vmem:[%s267_s11] sm:$0xff] %vm388_vm3, %v762_v38 }
 0x382   : > { %v776_v40 = vmul.f32 %v774_v39, %v774_v39  ;;  %v773_v1 = vmul.f32 %v1298_v35, %v771_v14 }
 0x384   : > { %v775_v41 = vmul.f32 %v773_v1, %v773_v1  ;;  %v778_v43 = vsel %vm513_vm13, %v776_v40, 0.0 }
 0x386   : > { %v777_v42 = vsel %vm388_vm3, %v775_v41, 0.0 }
 0x387   : > { %v779_v44 = vadd.f32 %v778_v43, %v777_v42 }
 0x389   : > { %780 = vadd.xlane.f32.xlu0 %v779_v44 }
 0x38a   : > { %1082 = shalt.err (!%p1079_p5)
}
 0x38b   : > { %s1083_s24 = scalar_lea.hbm %s814_s17, 128  ;;  %s1087_s11 = scalar_lea.hbm %s1414_s5, 256 }
 0x38c   : > { %p1084_p6 = scmp.ne.s32.totalorder %s814_s17, %s1083_s24  ;;  %p1088_p10 = scmp.lt.s32.totalorder %s814_s17, %s1414_s5 }
 0x38d   : > { %p1089_p11 = scmp.lt.s32.totalorder %s1087_s11, %s1083_s24 }
 0x38e   : > { %p1085_p7 = pnand %p1084_p6, %p1225_p4 }
 0x38f   : > { %p1090_p12 = por %p1089_p11, %p1088_p10 }
 0x390   : > { %p1086_p9 = pneg %p1085_p7 }
 0x392   : > { %p1091_p13 = pnand %p1090_p12, %p1086_p9 }
 0x394   : > { %1094 = shalt.err (!%p1091_p13)
}
 0x395   : > { %1012 = dma.vmem_to_hbm [thread:$0]  (%p1225_p4), %s817_s14, 128, %s814_s17, %s796_s18   ;;  %vm525_vm3 = vcmp.eq.s32.totalorder %v1293_v32, 0  ;;  %vm789_vm13 = vcmp.eq.s32.totalorder %v1293_v32, 1 }
 0x396   : > { %s1009_s16 = spop %1008  ;;  %s288_s17 = scalar_lea.vmem %s1415_s6, %s1250_s13 }
 0x397   : > { %v526_v49 = vstv %s1009_s16 }
 0x398   : > { %v527_v51 = vsel %vm525_vm3, %v526_v49, 0.0 }
 0x412   : > { %v781_v33 = vpop.xlane.xlu0 %780 }
 0x413   : > { %v782_v35 = vrot.slane %v781_v33, 4 }
 0x415   : > { %v783_v37 = vadd.f32 %v782_v35, %v781_v33 }
 0x417   : > { %v784_v45 = vrot.slane %v783_v37, 2 }
 0x419   : > { %v785_v46 = vadd.f32 %v784_v45, %v783_v37 }
 0x41b   : > { %v786_v47 = vrot.slane %v785_v46, 1 }
 0x41d   : > { %v787_v48 = vadd.f32 %v786_v47, %v785_v46 }
 0x41f   : > { %1010 = vpush %v787_v48 }
 0x450   : > { %s1011_s19 = spop %1010 }
 0x451   : > { %v790_v50 = vstv %s1011_s19 }
 0x452   : > { %v791_v52 = vsel %vm789_vm13, %v790_v50, 0.0 }
 0x453   : > { %v792_v53 = vadd.f32 %v791_v52, %v527_v51 }
 0x455   : > { %794 = vst [vmem:[%s288_s17] sm:$0x1] %v792_v53 }
 0x456 PF: > { %p1018_p4 = scmp.ge.s32.totalorder %s1145_s26, 2  ;;  %s831_s18 = sand.u32 1, %s1125_s21  }
 0x457   : > { %s832_s20 = scalar_lea.sflag [#allocation3], %s831_s18 }
 0x458   : > { %p1015_p0 = pnand %p1018_p4, %p1232_p8 }
 0x45a   : > { %p1016_p1 = pneg %p1015_p0 }
 0x45c   : > { %1120 = dma.done.wait (%p1016_p1), %s832_s20, 128  }
 0x45d   : > { %1122 = vsyncadd (%p1016_p1), %s832_s20, 4294967168  ;;  %s20_s26 = sadd.s32 1, %s1145_s26   ;;  %s1418_s21 = smov %s1129_s22 }
 0x45e   : > { %p17_p2 = scmp.ge.s32.totalorder %s20_s26, 4   ;;  %s1419_s22 = smov %s1133_s23 }
 0x45f   : > { %s1420_s23 = smov %s1238_s10  ;;  %s1421_s24 = smov %s1141_s25 }
 0x460   : > { %s1422_s25 = smov %s1424_s29  ;;  %19 = sbr.rel (!%p17_p2) target bundleno = 4 (0x4), region = 87 }
 0x465   :  { %846 = vsyncpa [#allocation3], 1 }
 0x466   :  { %848 = vsyncpa [#allocation3 + $0x1], 1 }

// kernel: _hier_vq_forward_impl.1
= control target key start
LH: loop header
LB: loop body
LE: loop exit
PB: predicated region body
PF: predicated region fallthrough
CT: control target
= control target key end

     0   :  { %12 = vsyncpa [#allocation3], 0  ;;  %s1409_s0 = inlined_call_operand.vmem [shape: f32[2,8,64], index: 0, kind: input, shape index: {}]   ;;  %s1410_s1 = inlined_call_operand.vmem [shape: f32[16,9], index: 1, kind: input, shape index: {}]   ;;  %s1411_s2 = inlined_call_operand.vmem [shape: f32[9,16], index: 2, kind: input, shape index: {}]   ;;  %s1412_s3 = inlined_call_operand.vmem [shape: f32[32,9], index: 3, kind: input, shape index: {}]   ;;  %s1413_s4 = inlined_call_operand.vmem [shape: f32[9,32], index: 4, kind: input, shape index: {}]   ;;  %s1414_s5 = inlined_call_operand.hbm [shape: f32[2,8,64], index: 5, kind: output, shape index: {0}]   ;;  %s1415_s6 = inlined_call_operand.vmem [shape: f32[2,1,1,128], index: 6, kind: output, shape index: {1}]  }
   0x1   :  { %14 = vsyncpa [#allocation3 + $0x1], 0  ;;  %s1185_s21 = smov 0   ;;  %s1187_s22 = smov 0  }
   0x2   :  { %s1189_s23 = smov 0   ;;  %s1191_s24 = smov 0  }
   0x3   :  { %s1193_s25 = smov 0   ;;  %s1195_s26 = smov 0  }
   0x4 LB: > { %s916_s27 = sadd.s32 4294967295, %s1145_s26   ;;  %s917_s28 = sadd.s32 4294967294, %s1145_s26   ;;  %s1145_s26 = sphi %s1195_s26, %s20_s26   ;;  %s1141_s25 = sphi %s1193_s25, %s1422_s25   ;;  %s1137_s24 = sphi %s1191_s24, %s1421_s24   ;;  %s1133_s23 = sphi %s1189_s23, %s1420_s23   ;;  %s1129_s22 = sphi %s1187_s22, %s1419_s22   ;;  %s1125_s21 = sphi %s1185_s21, %s1418_s21  }
   0x5   : > { %s32_s29 = sadd.s32 1, %s1141_s25  ;;  %s153_s30 = sadd.s32 1, %s1133_s23 }
   0x6   : > { %p34_p0 = scmp.ge.s32.totalorder %s32_s29, 2  ;;  %p163_p1 = scmp.ne.s32.totalorder %s1133_s23, %s1129_s22 }
   0x7   : > { %p164_p2 = scmp.eq.s32.totalorder %s916_s27, 1  ;;  %p169_p3 = scmp.ne.s32.totalorder %s1129_s22, %s1125_s21 }
   0x8   : > { %s1424_s29 = smov (%p34_p0, %s32_s29), 0  ;;  %p170_p5 = scmp.eq.s32.totalorder %s917_s28, 1 }
   0x9   : > { %p1225_p4 = por %p164_p2, %p163_p1  ;;  %s148_s8 = ssub.s32 %s1141_s25, %s1424_s29 }
   0xa   : > { %p920_p6 = scmp.ge.s32.totalorder %s1145_s26, 1  ;;  %p151_p7 = scmp.eq.s32.totalorder %s148_s8, 0 }
   0xb   : > { %p1232_p8 = por %p170_p5, %p169_p3  ;;  %p238_p9 = scmp.lt.s32.totalorder %s1145_s26, 3 }
   0xc   : > { %s1238_s10 = scalar_select %p151_p7, %s1133_s23, %s153_s30  }
   0xd   : > { %p239_p10 = pnand %p920_p6, %p238_p9 }
   0xe   : > { %p276_p11 = scmp.lt.s32.totalorder (!%p239_p10), %s1137_s24, 1  ;;  %s265_s30 = sand.u32 (!%p239_p10), 1, %s1129_s22  }
   0xf   : > { %242 = sbr.rel (%p239_p10) target bundleno = 1110 (0x456), region = 40  ;;  %s921_s8 = sshll.u32 (!%p239_p10), %s265_s30, 3 }
  0x10   : > { %s267_s11 = scalar_lea.vmem (!%p239_p10), [#allocation2], %s921_s8  ;;  %s950_s12 = sshll.u32 (!%p239_p10), %s1137_s24, 7 }
  0x11   : > { %s796_s18 = scalar_lea.sflag (!%p239_p10), [#allocation3], %s265_s30  ;;  %s1149_s20 = smov (!%p239_p10), [#allocation2]  }
  0x12   : > { %s1073_s27 = sshll.u32 (!%p239_p10), %s1149_s20, 4  ;;  %s1074_s27 = int_to_ptr.vmem [resolvable:$false] %s1073_s27 }
  0x13   : > { %s1075_s28 = scalar_lea.vmem (!%p239_p10), %s1074_s27, 256 }
  0x14   : > { %vm309_vm0 = vcmask 1040384   ;;  %v298_v0 = vld [vmem:[%s1410_s1] sm:$0xff]  ;;  %vm302_vm1 = vcmask 72704   ;;  %v1147_v1 = vmov 1.0   ;;  %s1250_s13 = scalar_select %p276_p11, %s1137_s24, 1  ;;  %v299_v3 = vld [vmem:[%s1410_s1 + $0x8] sm:$0xff]  ;;  %v291_v11 = vlaneseq }
  0x15   : > { %973 = vmatprep.subr.msk.mxu0 %vm309_vm0, %v1147_v1  ;;  %977 = vmatprep.mubr.msk.f32.mxu0 %vm302_vm1, %v298_v0  ;;  %v300_v4 = vld [vmem:[%s1411_s2] sm:$0xff]  ;;  %vm424_vm2 = vcmask 130048   ;;  %vm388_vm3 = vcmask 523264   ;;  %v301_v30 = vld [vmem:[%s1411_s2 + $0x8] sm:$0x1]  ;;  %v1148_v34 = vmov 0.0  }
  0x16   : > { %974 = vmatpush3.msk.msra.mxu0 %vm309_vm0, %v1147_v1  ;;  %s922_s14 = sshll.u32 %s1250_s13, 3  ;;  %984 = vmatprep.mubr.msk.f32.mxu1 %vm424_vm2, %v300_v4  ;;  %v1270_v14 = vshrl.u32 %v291_v11, 7  ;;  %v529_v31 = vld [vmem:[%s1412_s3] sm:$0xff]  ;;  %v1293_v32 = vand.u32 127, %v291_v11  ;;  %v530_v38 = vld [vmem:[%s1412_s3 + $0x8] sm:$0xff]  ;;  %v531_v39 = vld [vmem:[%s1412_s3 + $0x10] sm:$0xff] }
  0x17   : > { %s282_s17 = scalar_lea.vmem %s1409_s0, %s922_s14  ;;  %v532_v44 = vld [vmem:[%s1412_s3 + $0x18] sm:$0xff]  ;;  %vm513_vm13 = vcmask 516096   ;;  %v533_v49 = vld [vmem:[%s1413_s4] sm:$0xff]  ;;  %vm689_vm14 = vcmask 261120   ;;  %s816_s14 = sshll.u32 %s267_s11, 4  ;;  %s817_s14 = int_to_ptr.vmem [resolvable:$true] %s816_s14 }
  0x18   : > { %v1256_v2 = vld [vmem:[%s282_s17] sm:$0xff]  ;;  %v1273_v17 = vadd.s32 8, %v1270_v14  ;;  %vm295_vm12 = vcmp.lt.s32.totalorder %v1293_v32, 64  ;;  %v649_v11 = vadd.s32 24, %v1270_v14  ;;  %s814_s17 = scalar_lea.hbm %s1414_s5, %s950_s12  ;;  %s1069_s19 = scalar_lea.vmem %s817_s14, 128 }
  0x19   : > { %975 = vmatprep.subr.mxu0 %v1256_v2  ;;  %v1298_v35 = vsel %vm295_vm12, 1.0, %v1148_v34  ;;  %v534_v34 = vld [vmem:[%s1413_s4 + $0x8] sm:$0x1]  ;;  %p1070_p12 = scmp.ne.s32.totalorder %s817_s14, %s1069_s19  ;;  %p1076_p1 = scmp.lt.s32.totalorder %s817_s14, %s1074_s27 }
  0x1a   : > { %976 = vmatpush3.msra.mxu0 %v1256_v2  ;;  %p1077_p2 = scmp.lt.s32.totalorder %s1075_s28, %s1069_s19 }
  0x1b   : > { %978 = vmatmul.mubr.msk.f32.vlgmr.msra.gmra.mxu0 %vm302_vm1, %v299_v3  ;;  %p1071_p13 = pnand %p1070_p12, %p1225_p4 }
  0x1c   : > { %991 = vmatprep.mubr.msk.f32.mxu0 %vm302_vm1, %v529_v31  ;;  %p1078_p3 = por %p1077_p2, %p1076_p1 }
  0x1d   : > { %p1072_p0 = pneg %p1071_p13 }
  0x1f   : > { %p1079_p5 = pnand %p1078_p3, %p1072_p0 }
  0xdb   : > { %v979_v5 = vpop.f32.mrf.mxu0 }
  0xdc   : > { %v390_v7 = vsel %vm388_vm3, %v979_v5, inf }
  0xdd   : > { %v379_v6 = vpop.f32.mrf.mxu0 }
  0xde   : > { %v389_v8 = vsel %vm388_vm3, %v379_v6, inf }
  0xdf   : > { %v391_v9 = vmin.f32 %v389_v8, %v390_v7 }
  0xe1   : > { %v392_v10 = vrot.slane %v391_v9, 4 }
  0xe3   : > { %v393_v12 = vmin.f32 %v391_v9, %v392_v10  ;;  %v648_v10 = vadd.s32 16, %v1270_v14 }
  0xe5   : > { %v394_v13 = vrot.slane %v393_v12, 2 }
  0xe7   : > { %v395_v15 = vmin.f32 %v393_v12, %v394_v13 }
  0xe9   : > { %v396_v16 = vrot.slane %v395_v15, 1 }
  0xeb   : > { %v397_v18 = vmin.f32 %v395_v15, %v396_v16 }
  0xed   : > { %vm401_vm4 = vcmp.eq.f32.partialorder %v379_v6, %v397_v18  ;;  %vm402_vm5 = vcmp.eq.f32.partialorder %v979_v5, %v397_v18 }
  0xee   : > { %v403_v19 = vsel %vm401_vm4, %v1270_v14, 16  ;;  %v404_v20 = vsel %vm402_vm5, %v1273_v17, 16 }
  0xef   : > { %v405_v21 = vsel %vm388_vm3, %v403_v19, 2147483647  ;;  %v406_v22 = vsel %vm388_vm3, %v404_v20, 2147483647 }
  0xf0   : > { %vm407_vm6 = vcmp.lt.s32.totalorder %v405_v21, %v406_v22 }
  0xf1   : > { %v408_v23 = vsel %vm407_vm6, %v405_v21, %v406_v22 }
  0xf2   : > { %v409_v24 = vrot.slane %v408_v23, 4 }
  0xf4   : > { %vm410_vm7 = vcmp.lt.s32.totalorder %v408_v23, %v409_v24 }
  0xf5   : > { %v411_v25 = vsel %vm410_vm7, %v408_v23, %v409_v24 }
  0xf6   : > { %v412_v26 = vrot.slane %v411_v25, 2 }
  0xf8   : > { %vm413_vm8 = vcmp.lt.s32.totalorder %v411_v25, %v412_v26 }
  0xf9   : > { %v414_v27 = vsel %vm413_vm8, %v411_v25, %v412_v26 }
  0xfa   : > { %v415_v28 = vrot.slane %v414_v27, 1 }
  0xfc   : > { %vm416_vm9 = vcmp.lt.s32.totalorder %v414_v27, %v415_v28 }
  0xfd   : > { %v417_v29 = vsel %vm416_vm9, %v414_v27, %v415_v28 }
  0xfe   : > { %vm419_vm10 = vcmp.eq.s32.totalorder %v1273_v17, %v417_v29  ;;  %vm418_vm11 = vcmp.eq.s32.totalorder %v1270_v14, %v417_v29 }
  0xff   : > { %980 = vmatprep.subr.msk.mxu1 %vm419_vm10, %v1147_v1 }
 0x100   : > { %981 = vmatpush3.msk.msra.mxu1 %vm419_vm10, %v1147_v1 }
 0x101   : > { %982 = vmatprep.subr.msk.mxu1 %vm418_vm11, %v1147_v1 }
 0x102   : > { %983 = vmatpush3.msk.msra.mxu1 %vm418_vm11, %v1147_v1 }
 0x103   : > { %985 = vmatmul.mubr.msk.f32.vlgmr.msra.gmra.mxu1 %vm424_vm2, %v301_v30 }
 0x104   : > { %1005 = vmatprep.mubr.msk.f32.mxu1 %vm689_vm14, %v533_v49 }
 0x1c3   : > { %v1296_v33 = vpop.f32.mrf.mxu1 }
 0x1c4   : > { %987 = vmatprep.subr.msk.mxu0 %vm309_vm0, %v1296_v33  ;;  %v933_v36 = vadd.f32 -1.0, %v1296_v33 }
 0x1c5   : > { %v1303_v37 = vpop.f32.mrf.mxu1  ;;  %988 = vmatpush3.msk.msra.mxu0 %vm309_vm0, %v1296_v33 }
 0x1c6   : > { %989 = vmatprep.subr.mxu0 %v1303_v37  ;;  %v506_v40 = vsub.f32 %v1303_v37, %v1256_v2  ;;  %v509_v41 = vmul.f32 %v933_v36, %v1298_v35 }
 0x1c7   : > { %990 = vmatpush3.msra.mxu0 %v1303_v37 }
 0x1c8   : > { %992 = vmatmul.mubr.msk.f32.vlgmr.msra.gmra.mxu0 %vm302_vm1, %v530_v38  ;;  %v508_v42 = vmul.f32 %v1298_v35, %v506_v40  ;;  %v511_v43 = vmul.f32 %v509_v41, %v509_v41 }
 0x1c9   : > { %994 = vmatprep.mubr.msk.f32.mxu0 %vm302_vm1, %v531_v39 }
 0x1ca   : > { %v510_v45 = vmul.f32 %v508_v42, %v508_v42  ;;  %v514_v47 = vsel %vm513_vm13, %v511_v43, 0.0 }
 0x1cc   : > { %995 = vmatmul.mubr.msk.f32.gmra.mxu0 %vm302_vm1, %v532_v44  ;;  %v512_v46 = vsel %vm388_vm3, %v510_v45, 0.0 }
 0x1cd   : > { %v515_v48 = vadd.f32 %v514_v47, %v512_v46 }
 0x1cf   : > { %516 = vadd.xlane.f32.xlu0 %v515_v48 }
 0x258   : > { %v517_v50 = vpop.xlane.xlu0 %516 }
 0x259   : > { %v518_v51 = vrot.slane %v517_v50, 4 }
 0x25b   : > { %v519_v52 = vadd.f32 %v518_v51, %v517_v50 }
 0x25d   : > { %v520_v53 = vrot.slane %v519_v52, 2 }
 0x25f   : > { %v521_v54 = vadd.f32 %v520_v53, %v519_v52 }
 0x261   : > { %v522_v55 = vrot.slane %v521_v54, 1 }
 0x263   : > { %v523_v56 = vadd.f32 %v522_v55, %v521_v54 }
 0x265   : > { %1008 = vpush %v523_v56 }
 0x288   : > { %v993_v57 = vpop.f32.mrf.mxu0 }
 0x289   : > { %v636_v62 = vsel %vm388_vm3, %v993_v57, inf }
 0x28a   : > { %v616_v58 = vpop.f32.mrf.mxu0 }
 0x28b   : > { %v635_v60 = vsel %vm388_vm3, %v616_v58, inf }
 0x28c   : > { %v996_v59 = vpop.f32.mrf.mxu0  ;;  %v639_v2 = vmin.f32 %v635_v60, %v636_v62 }
 0x28d   : > { %v638_v63 = vsel %vm388_vm3, %v996_v59, inf }
 0x28e   : > { %v626_v61 = vpop.f32.mrf.mxu0 }
 0x28f   : > { %v637_v0 = vsel %vm388_vm3, %v626_v61, inf }
 0x290   : > { %v640_v3 = vmin.f32 %v637_v0, %v638_v63 }
 0x292   : > { %v641_v4 = vmin.f32 %v639_v2, %v640_v3 }
 0x294   : > { %v642_v5 = vrot.slane %v641_v4, 4 }
 0x296   : > { %v643_v6 = vmin.f32 %v641_v4, %v642_v5 }
 0x298   : > { %v644_v7 = vrot.slane %v643_v6, 2 }
 0x29a   : > { %v645_v8 = vmin.f32 %v643_v6, %v644_v7 }
 0x29c   : > { %v646_v9 = vrot.slane %v645_v8, 1 }
 0x29e   : > { %v647_v12 = vmin.f32 %v645_v8, %v646_v9 }
 0x2a0   : > { %vm650_vm15 = vcmp.eq.f32.partialorder %v616_v58, %v647_v12  ;;  %vm651_vm0 = vcmp.eq.f32.partialorder %v993_v57, %v647_v12  ;;  %vm652_vm1 = vcmp.eq.f32.partialorder %v626_v61, %v647_v12  ;;  %vm653_vm2 = vcmp.eq.f32.partialorder %v996_v59, %v647_v12 }
 0x2a1   : > { %v654_v13 = vsel %vm650_vm15, %v1270_v14, 32  ;;  %v655_v15 = vsel %vm651_vm0, %v1273_v17, 32  ;;  %v656_v16 = vsel %vm652_vm1, %v648_v10, 32  ;;  %v657_v18 = vsel %vm653_vm2, %v649_v11, 32 }
 0x2a2   : > { %v658_v19 = vsel %vm388_vm3, %v654_v13, 2147483647  ;;  %v659_v20 = vsel %vm388_vm3, %v655_v15, 2147483647  ;;  %v660_v21 = vsel %vm388_vm3, %v656_v16, 2147483647 }
 0x2a3   : > { %v661_v22 = vsel %vm388_vm3, %v657_v18, 2147483647  ;;  %vm662_vm4 = vcmp.lt.s32.totalorder %v658_v19, %v659_v20 }
 0x2a4   : > { %v663_v23 = vsel %vm662_vm4, %v658_v19, %v659_v20  ;;  %vm664_vm5 = vcmp.lt.s32.totalorder %v660_v21, %v661_v22 }
 0x2a5   : > { %v665_v24 = vsel %vm664_vm5, %v660_v21, %v661_v22 }
 0x2a6   : > { %vm666_vm6 = vcmp.lt.s32.totalorder %v663_v23, %v665_v24 }
 0x2a7   : > { %v667_v25 = vsel %vm666_vm6, %v663_v23, %v665_v24 }
 0x2a8   : > { %v668_v26 = vrot.slane %v667_v25, 4 }
 0x2aa   : > { %vm669_vm7 = vcmp.lt.s32.totalorder %v667_v25, %v668_v26 }
 0x2ab   : > { %v670_v27 = vsel %vm669_vm7, %v667_v25, %v668_v26 }
 0x2ac   : > { %v671_v28 = vrot.slane %v670_v27, 2 }
 0x2ae   : > { %vm672_vm8 = vcmp.lt.s32.totalorder %v670_v27, %v671_v28 }
 0x2af   : > { %v673_v29 = vsel %vm672_vm8, %v670_v27, %v671_v28 }
 0x2b0   : > { %v674_v30 = vrot.slane %v673_v29, 1 }
 0x2b2   : > { %vm675_vm9 = vcmp.lt.s32.totalorder %v673_v29, %v674_v30 }
 0x2b3   : > { %v676_v31 = vsel %vm675_vm9, %v673_v29, %v674_v30 }
 0x2b4   : > { %vm680_vm10 = vcmp.eq.s32.totalorder %v649_v11, %v676_v31  ;;  %vm679_vm11 = vcmp.eq.s32.totalorder %v648_v10, %v676_v31  ;;  %vm678_vm12 = vcmp.eq.s32.totalorder %v1273_v17, %v676_v31  ;;  %vm677_vm15 = vcmp.eq.s32.totalorder %v1270_v14, %v676_v31 }
 0x2b5   : > { %997 = vmatprep.subr.msk.mxu1 %vm680_vm10, %v1147_v1 }
 0x2b6   : > { %998 = vmatpush3.msk.msra.mxu1 %vm680_vm10, %v1147_v1 }
 0x2b7   : > { %999 = vmatprep.subr.msk.mxu1 %vm679_vm11, %v1147_v1 }
 0x2b8   : > { %1000 = vmatpush3.msk.msra.mxu1 %vm679_vm11, %v1147_v1 }
 0x2b9   : > { %1001 = vmatprep.subr.msk.mxu1 %vm678_vm12, %v1147_v1 }
 0x2ba   : > { %1002 = vmatpush3.msk.msra.mxu1 %vm678_vm12, %v1147_v1 }
 0x2bb   : > { %1003 = vmatprep.subr.msk.mxu1 %vm677_vm15, %v1147_v1 }
 0x2bc   : > { %1004 = vmatpush3.msk.msra.mxu1 %vm677_vm15, %v1147_v1 }
 0x2bd   : > { %1006 = vmatmul.mubr.msk.f32.vlgmr.msra.gmra.mxu1 %vm689_vm14, %v534_v34 }
 0x37d   : > { %v1007_v17 = vpop.f32.mrf.mxu1 }
 0x37e   : > { %v772_v36 = vsub.f32 %v1007_v17, %v1296_v33 }
 0x37f   : > { %v762_v38 = vpop.f32.mrf.mxu1 }
 0x380   : > { %v774_v39 = vmul.f32 %v1298_v35, %v772_v36  ;;  %v771_v14 = vsub.f32 %v762_v38, %v1303_v37  ;;  %793 = vst.msk [vmem:[%s267_s11] sm:$0xff] %vm388_vm3, %v762_v38 }
 0x382   : > { %v776_v40 = vmul.f32 %v774_v39, %v774_v39  ;;  %v773_v1 = vmul.f32 %v1298_v35, %v771_v14 }
 0x384   : > { %v775_v41 = vmul.f32 %v773_v1, %v773_v1  ;;  %v778_v43 = vsel %vm513_vm13, %v776_v40, 0.0 }
 0x386   : > { %v777_v42 = vsel %vm388_vm3, %v775_v41, 0.0 }
 0x387   : > { %v779_v44 = vadd.f32 %v778_v43, %v777_v42 }
 0x389   : > { %780 = vadd.xlane.f32.xlu0 %v779_v44 }
 0x38a   : > { %1082 = shalt.err (!%p1079_p5)
}
 0x38b   : > { %s1083_s24 = scalar_lea.hbm %s814_s17, 128  ;;  %s1087_s11 = scalar_lea.hbm %s1414_s5, 256 }
 0x38c   : > { %p1084_p6 = scmp.ne.s32.totalorder %s814_s17, %s1083_s24  ;;  %p1088_p10 = scmp.lt.s32.totalorder %s814_s17, %s1414_s5 }
 0x38d   : > { %p1089_p11 = scmp.lt.s32.totalorder %s1087_s11, %s1083_s24 }
 0x38e   : > { %p1085_p7 = pnand %p1084_p6, %p1225_p4 }
 0x38f   : > { %p1090_p12 = por %p1089_p11, %p1088_p10 }
 0x390   : > { %p1086_p9 = pneg %p1085_p7 }
 0x392   : > { %p1091_p13 = pnand %p1090_p12, %p1086_p9 }
 0x394   : > { %1094 = shalt.err (!%p1091_p13)
}
 0x395   : > { %1012 = dma.vmem_to_hbm [thread:$0]  (%p1225_p4), %s817_s14, 128, %s814_s17, %s796_s18   ;;  %vm525_vm3 = vcmp.eq.s32.totalorder %v1293_v32, 0  ;;  %vm789_vm13 = vcmp.eq.s32.totalorder %v1293_v32, 1 }
 0x396   : > { %s1009_s16 = spop %1008  ;;  %s288_s17 = scalar_lea.vmem %s1415_s6, %s1250_s13 }
 0x397   : > { %v526_v49 = vstv %s1009_s16 }
 0x398   : > { %v527_v51 = vsel %vm525_vm3, %v526_v49, 0.0 }
 0x412   : > { %v781_v33 = vpop.xlane.xlu0 %780 }
 0x413   : > { %v782_v35 = vrot.slane %v781_v33, 4 }
 0x415   : > { %v783_v37 = vadd.f32 %v782_v35, %v781_v33 }
 0x417   : > { %v784_v45 = vrot.slane %v783_v37, 2 }
 0x419   : > { %v785_v46 = vadd.f32 %v784_v45, %v783_v37 }
 0x41b   : > { %v786_v47 = vrot.slane %v785_v46, 1 }
 0x41d   : > { %v787_v48 = vadd.f32 %v786_v47, %v785_v46 }
 0x41f   : > { %1010 = vpush %v787_v48 }
 0x450   : > { %s1011_s19 = spop %1010 }
 0x451   : > { %v790_v50 = vstv %s1011_s19 }
 0x452   : > { %v791_v52 = vsel %vm789_vm13, %v790_v50, 0.0 }
 0x453   : > { %v792_v53 = vadd.f32 %v791_v52, %v527_v51 }
 0x455   : > { %794 = vst [vmem:[%s288_s17] sm:$0x1] %v792_v53 }
 0x456 PF: > { %p1018_p4 = scmp.ge.s32.totalorder %s1145_s26, 2  ;;  %s831_s18 = sand.u32 1, %s1125_s21  }
 0x457   : > { %s832_s20 = scalar_lea.sflag [#allocation3], %s831_s18 }
 0x458   : > { %p1015_p0 = pnand %p1018_p4, %p1232_p8 }
 0x45a   : > { %p1016_p1 = pneg %p1015_p0 }
 0x45c   : > { %1120 = dma.done.wait (%p1016_p1), %s832_s20, 128  }
 0x45d   : > { %1122 = vsyncadd (%p1016_p1), %s832_s20, 4294967168  ;;  %s20_s26 = sadd.s32 1, %s1145_s26   ;;  %s1418_s21 = smov %s1129_s22 }
 0x45e   : > { %p17_p2 = scmp.ge.s32.totalorder %s20_s26, 4   ;;  %s1419_s22 = smov %s1133_s23 }
 0x45f   : > { %s1420_s23 = smov %s1238_s10  ;;  %s1421_s24 = smov %s1141_s25 }
 0x460   : > { %s1422_s25 = smov %s1424_s29  ;;  %19 = sbr.rel (!%p17_p2) target bundleno = 4 (0x4), region = 87 }
 0x465   :  { %846 = vsyncpa [#allocation3], 1 }
 0x466   :  { %848 = vsyncpa [#allocation3 + $0x1], 1 }

</bundles_post_ra>
